<compile_context>
chip_gen: v7x
topology: tpu7x:2x2x1
jax: 0.10.0
libtpu: 0.0.40
codegen_flags: <defaults>
</compile_context>

<pallas_src>
import functools

import jax
import jax.numpy as jnp
from jax.experimental import pallas as pl
from jax.experimental.pallas import tpu as pltpu


_VMEM_LIMIT_BYTES = 48 * 1024 * 1024       # scoped limit: fits v7x (64 MiB phys), roomy on v5e/v6e
_TARGET_BLOCK_BYTES = 4 * 1024 * 1024      # ~4 MiB x tiles -> step overhead <10% even at 3.2 TB/s
_HARD_BLOCK_BYTES = 12 * 1024 * 1024       # above this we pad to a 128-multiple instead of one block
_RESIDENT_LIMIT_BYTES = 8 * 1024 * 1024    # x (as f32) below this -> fused single-pass path


# ----------------------------------------------------------------------------
# Kernels
# ----------------------------------------------------------------------------
def _sum_keepdims(x, axes):
    # Sequential single-axis reductions (lane reduce first) — safe lowering.
    for ax in sorted(axes, reverse=True):
        x = jnp.sum(x, axis=ax, keepdims=True)
    return x


def _bn_apply_kernel(x_ref, scale_ref, shift_ref, y_ref):
    """y = x * scale + shift (scale/shift broadcast)."""
    x = x_ref[...].astype(jnp.float32)
    y_ref[...] = (x * scale_ref[...] + shift_ref[...]).astype(y_ref.dtype)


def _bn_partial_stats_kernel(x_ref, pivot_ref, sum_ref, sq_ref, *, reduce_axes):
    """Accumulate per-channel sum / sum-of-squares of (x - pivot) into per-parallel-chunk
    output blocks.  Grid = (parallel chunks, accumulation tiles)."""
    t = pl.program_id(1)

    @pl.when(t == 0)
    def _():
        sum_ref[...] = jnp.zeros_like(sum_ref)
        sq_ref[...] = jnp.zeros_like(sq_ref)

    d = x_ref[...].astype(jnp.float32) - pivot_ref[...]
    sum_ref[...] += _sum_keepdims(d, reduce_axes).reshape(sum_ref.shape)
    sq_ref[...] += _sum_keepdims(d * d, reduce_axes).reshape(sq_ref.shape)


def _bn_resident_kernel(x_ref, w_ref, b_ref, y_ref, mean_ref, var_ref,
                        *, eps, inv_count, reduce_axes):
    """Fused single-pass BN (x fully resident in VMEM): stats + normalize, 1 read / 1 write."""
    x = x_ref[...].astype(jnp.float32)
    mean = _sum_keepdims(x, reduce_axes) * inv_count
    d = x - mean
    var = _sum_keepdims(d * d, reduce_axes) * inv_count
    scale = w_ref[...] * jax.lax.rsqrt(var + eps)
    y_ref[...] = (d * scale + b_ref[...]).astype(y_ref.dtype)
    mean_ref[...] = mean
    var_ref[...] = var


# ----------------------------------------------------------------------------
# Tiling helpers
# ----------------------------------------------------------------------------
def _largest_aligned_divisor(total, mult, cap):
    """Largest d with d % mult == 0, total % d == 0, d <= cap; 0 if none exists."""
    cap = min(cap, total)
    best, d = 0, mult
    while d <= cap:
        if total % d == 0:
            best = d
        d += mult
    return best


def _apply_layout(M, L, itemsize):
    """Tiles for the flattened (M, L) apply pass. Returns (tm, tl, pad_m, pad_l)."""
    target = _TARGET_BLOCK_BYTES
    row_min = min(M, 8)
    pad_l = 0
    if L % 128 == 0:
        tl = _largest_aligned_divisor(L, 128, max(128, target // (row_min * itemsize)))
    elif row_min * L * itemsize <= _HARD_BLOCK_BYTES:
        tl = L                                           # full-extent lane dim is legal
    else:
        pad_l = (-L) % 128
        L += pad_l
        tl = _largest_aligned_divisor(L, 128, max(128, target // (row_min * itemsize)))
    pad_m = 0
    tm = _largest_aligned_divisor(M, 8, max(8, target // max(tl * itemsize, 1)))
    if tm == 0:
        if M <= 8 or M * tl * itemsize <= _HARD_BLOCK_BYTES:
            tm = M                                       # full-extent row dim is legal
        else:
            pad_m = (-M) % 8
            M += pad_m
            tm = _largest_aligned_divisor(M, 8, max(8, target // max(tl * itemsize, 1)))
    return tm, tl, pad_m, pad_l


# ----------------------------------------------------------------------------
# pallas_call wrappers
# ----------------------------------------------------------------------------
def _bn_apply_flat(x2, scale_l, shift_l):
    """Lane-dense elementwise pass on x2: (M, L); scale_l/shift_l: (L,) f32."""
    M, L = x2.shape
    tm, tl, pad_m, pad_l = _apply_layout(M, L, x2.dtype.itemsize)
    xp, sp, bp = x2, scale_l, shift_l
    if pad_m or pad_l:
        xp = jnp.pad(x2, ((0, pad_m), (0, pad_l)))
        if pad_l:
            sp = jnp.pad(scale_l, (0, pad_l))
            bp = jnp.pad(shift_l, (0, pad_l))
    Mp, Lp = xp.shape
    # Lane tiles on the OUTER grid axis so the (1, tl) scale/shift blocks keep the same
    # block index across inner row steps (copy skipped -> params fetched once per lane tile).
    grid = (Lp // tl, Mp // tm)
    x_spec = pl.BlockSpec((tm, tl), lambda j, i: (i, j))
    p_spec = pl.BlockSpec((1, tl), lambda j, i: (0, j))
    y = pl.pallas_call(
        _bn_apply_kernel,
        out_shape=jax.ShapeDtypeStruct((Mp, Lp), x2.dtype),
        grid=grid,
        in_specs=[x_spec, p_spec, p_spec],
        out_specs=x_spec,
        compiler_params=pltpu.CompilerParams(
            dimension_semantics=("parallel", "parallel"),
            vmem_limit_bytes=_VMEM_LIMIT_BYTES),
    )(xp, sp.reshape(1, Lp), bp.reshape(1, Lp))
    if pad_m or pad_l:
        y = y[:M, :L]
    return y


def _bn_apply_channel(x3, scale_c, shift_c):
    """Channel-layout elementwise pass on x3: (N, C, HW), HW % 128 == 0, C >= 8."""
    N, C, HW = x3.shape
    ib = x3.dtype.itemsize
    thw = _largest_aligned_divisor(HW, 128, max(128, _TARGET_BLOCK_BYTES // (C * ib)))
    tn = max(1, min(N, _TARGET_BLOCK_BYTES // max(C * thw * ib, 1)))
    while N % tn:
        tn -= 1
    grid = (N // tn, HW // thw)
    x_spec = pl.BlockSpec((tn, C, thw), lambda i, j: (i, 0, j))
    p_spec = pl.BlockSpec((1, C, 1), lambda i, j: (0, 0, 0))
    return pl.pallas_call(
        _bn_apply_kernel,
        out_shape=jax.ShapeDtypeStruct(x3.shape, x3.dtype),
        grid=grid,
        in_specs=[x_spec, p_spec, p_spec],
        out_specs=x_spec,
        compiler_params=pltpu.CompilerParams(
            dimension_semantics=("parallel", "parallel"),
            vmem_limit_bytes=_VMEM_LIMIT_BYTES),
    )(x3, scale_c.reshape(1, C, 1), shift_c.reshape(1, C, 1))


def _stats_2d(x3, pivot_c, target_bytes):
    """x3: (N, C, HW). Returns (sum_c, sumsq_c, pivot_used) of (x - pivot) over (0, 2)."""
    N, C, HW = x3.shape
    ib = x3.dtype.itemsize
    if HW % 128 == 0:
        thw = _largest_aligned_divisor(HW, 128, max(128, target_bytes // (C * ib)))
    elif C * HW * ib <= _HARD_BLOCK_BYTES:
        thw = HW                                      # full-extent lane dim is legal
    else:
        pad = (-HW) % 128                             # pad fallback for oversized ragged HW
        x3 = jnp.pad(x3, ((0, 0), (0, 0), (0, pad)))
        pivot_c = jnp.zeros_like(pivot_c)             # zero pad + zero pivot keeps sums exact
        HW += pad
        thw = _largest_aligned_divisor(HW, 128, max(128, target_bytes // (C * ib)))
    tn = max(1, min(N, target_bytes // max(C * thw * ib, 1)))
    while N % tn:
        tn -= 1
    n_hw = HW // thw
    total = (N // tn) * n_hw
    n_par = 2 if (total >= 2 and total % 2 == 0) else 1      # v7x: both TensorCores
    t_steps = total // n_par

    x_spec = pl.BlockSpec(
        (tn, C, thw),
        lambda p, t: ((p * t_steps + t) // n_hw, 0, (p * t_steps + t) % n_hw))
    pivot_spec = pl.BlockSpec((1, C, 1), lambda p, t: (0, 0, 0))
    part_spec = pl.BlockSpec((1, C, 1), lambda p, t: (p, 0, 0))
    part_shape = jax.ShapeDtypeStruct((n_par, C, 1), jnp.float32)

    psum, psq = pl.pallas_call(
        functools.partial(_bn_partial_stats_kernel, reduce_axes=(0, 2)),
        out_shape=(part_shape, part_shape),
        grid=(n_par, t_steps),
        in_specs=[x_spec, pivot_spec],
        out_specs=(part_spec, part_spec),
        compiler_params=pltpu.CompilerParams(
            dimension_semantics=("parallel", "arbitrary"),
            vmem_limit_bytes=_VMEM_LIMIT_BYTES),
    )(x3, pivot_c.reshape(1, C, 1))
    return psum.sum(axis=(0, 2)), psq.sum(axis=(0, 2)), pivot_c


def _stats_1d(x2, pivot_c, target_bytes):
    """x2: (N, C). Returns (sum_c, sumsq_c, pivot_used) of (x - pivot) over axis 0."""
    N, C = x2.shape
    ib = x2.dtype.itemsize
    tn = _largest_aligned_divisor(N, 8, max(8, target_bytes // max(C * ib, 1)))
    if tn == 0:
        tn = N                                        # N < 8 or no mult-of-8 divisor: full extent
    total = N // tn
    n_par = 2 if (total >= 2 and total % 2 == 0) else 1
    t_steps = total // n_par

    x_spec = pl.BlockSpec((tn, C), lambda p, t: (p * t_steps + t, 0))
    pivot_spec = pl.BlockSpec((1, C), lambda p, t: (0, 0))
    part_spec = pl.BlockSpec((1, 1, C), lambda p, t: (p, 0, 0))
    part_shape = jax.ShapeDtypeStruct((n_par, 1, C), jnp.float32)

    psum, psq = pl.pallas_call(
        functools.partial(_bn_partial_stats_kernel, reduce_axes=(0,)),
        out_shape=(part_shape, part_shape),
        grid=(n_par, t_steps),
        in_specs=[x_spec, pivot_spec],
        out_specs=(part_spec, part_spec),
        compiler_params=pltpu.CompilerParams(
            dimension_semantics=("parallel", "arbitrary"),
            vmem_limit_bytes=_VMEM_LIMIT_BYTES),
    )(x2, pivot_c.reshape(1, C))
    return psum.sum(axis=(0, 1)), psq.sum(axis=(0, 1)), pivot_c


def _bn_resident(xk, w_p, b_p, eps, reduce_axes, pshape):
    """Fused single-pass BN (training w/ batch stats) for a VMEM-resident slab."""
    count = 1
    for ax in reduce_axes:
        count *= xk.shape[ax]
    zeros = tuple(0 for _ in range(xk.ndim))
    x_spec = pl.BlockSpec(xk.shape, lambda i: zeros)
    p_spec = pl.BlockSpec(pshape, lambda i: zeros)
    stat = jax.ShapeDtypeStruct(pshape, jnp.float32)
    return pl.pallas_call(
        functools.partial(_bn_resident_kernel, eps=float(eps),
                          inv_count=1.0 / float(count), reduce_axes=reduce_axes),
        out_shape=(jax.ShapeDtypeStruct(xk.shape, xk.dtype), stat, stat),
        grid=(1,),
        in_specs=[x_spec, p_spec, p_spec],
        out_specs=(x_spec, p_spec, p_spec),
        compiler_params=pltpu.CompilerParams(vmem_limit_bytes=_VMEM_LIMIT_BYTES),
    )(xk, w_p, b_p)


# ----------------------------------------------------------------------------
# Module wrapper (parameter bookkeeping; heavy work is in the Pallas kernels)
# ----------------------------------------------------------------------------
class BatchNormPallas:
    """JAX/Pallas port of AIDomains `_BatchNorm` (concrete-tensor path only)."""

    def __init__(self, out_features: int, dimensions: int,
                 affine: bool = False, momentum: float = 0.1, eps: float = 1e-5):
        assert dimensions in (1, 2)
        self.num_features = out_features
        self.dimensions = dimensions
        self.affine = affine
        self.momentum = momentum
        self.eps = eps

        # torch defaults: running_mean=0, running_var=1, weight=1, bias=0.
        self.running_mean = jnp.zeros((out_features,), jnp.float32)
        self.running_var = jnp.ones((out_features,), jnp.float32)
        self.weight = jnp.ones((out_features,), jnp.float32)
        self.bias = jnp.zeros((out_features,), jnp.float32)

        self.current_mean = None
        self.current_var = None
        self.training = True
        self.update_stat = True

        # Perf knobs (tests may lower these to force the tiled / multi-core paths).
        self.resident_limit_bytes = _RESIDENT_LIMIT_BYTES
        self.stats_target_bytes = _TARGET_BLOCK_BYTES

    def set_current_to_running(self):
        self.current_mean = self.running_mean
        self.current_var = self.running_var

    def _update_stats(self, mean_c, var_c, count):
        # NOTE: side-effecting Python-attribute updates; do not wrap forward() in jit/scan.
        self.current_mean = mean_c
        self.current_var = var_c
        m = self.momentum
        bessel = count / max(count - 1, 1)
        self.running_mean = (1.0 - m) * self.running_mean + m * mean_c
        self.running_var = (1.0 - m) * self.running_var + m * (var_c * bessel)

    # ---- forward --------------------------------------------------------------
    def forward(self, x):
        C = self.num_features
        if self.dimensions == 1:
            N, _ = x.shape
            HW = 1
            xs = x                               # stats layout (N, C)
            pshape, reduce_axes = (1, C), (0,)
        else:
            N, _, H, W = x.shape
            HW = H * W
            xs = x.reshape(N, C, HW)             # contiguous view, free (no transpose)
            pshape, reduce_axes = (1, C, 1), (0, 2)
        count = N * HW
        w = jnp.asarray(self.weight, jnp.float32).reshape(-1)
        b = jnp.asarray(self.bias, jnp.float32).reshape(-1)

        if self.training and self.update_stat:
            if x.size * 4 <= self.resident_limit_bytes:
                # Fused resident path: 1 read + 1 write of x over HBM.
                y_s, mean_p, var_p = _bn_resident(xs, w.reshape(pshape), b.reshape(pshape),
                                                  self.eps, reduce_axes, pshape)
                self._update_stats(mean_p.reshape(C), var_p.reshape(C), count)
                return y_s if self.dimensions == 1 else y_s.reshape(x.shape)
            # Tiled path: pivot-shifted partial sums in-kernel, tiny (C,)-sized finalize here.
            pivot = jnp.asarray(self.running_mean, jnp.float32)
            if self.dimensions == 1:
                s_c, q_c, pivot = _stats_1d(xs, pivot, self.stats_target_bytes)
            else:
                s_c, q_c, pivot = _stats_2d(xs, pivot, self.stats_target_bytes)
            mean_d = s_c / count
            mean_c = pivot + mean_d
            var_c = jnp.maximum(q_c / count - mean_d * mean_d, 0.0)
            self._update_stats(mean_c, var_c, count)
        else:
            if self.training:                    # frozen current stats
                assert self.current_mean is not None and self.current_var is not None
            else:                                # eval: use running stats
                self.set_current_to_running()
            mean_c = jnp.asarray(self.current_mean, jnp.float32)
            var_c = jnp.asarray(self.current_var, jnp.float32)

        # Per-channel scale/shift (tiny prep), then the lane-dense tiled apply pass.
        scale_c = w * jax.lax.rsqrt(var_c + jnp.float32(self.eps))
        shift_c = b - mean_c * scale_c

        if self.dimensions == 2 and HW % 128 == 0 and C >= 8:
            return _bn_apply_channel(xs, scale_c, shift_c).reshape(x.shape)
        # Small C / small or non-128 HW / 1d: flatten channels onto the lane axis.
        if self.dimensions == 2:
            x2 = xs.reshape(N, C * HW)
            y2 = _bn_apply_flat(x2, jnp.repeat(scale_c, HW), jnp.repeat(shift_c, HW))
            return y2.reshape(x.shape)
        return _bn_apply_flat(xs, scale_c, shift_c)

    __call__ = forward


# ----------------------------------------------------------------------------
# Self-test
# ----------------------------------------------------------------------------
if __name__ == "__main__":
    key = jax.random.PRNGKey(0)
    k1, k2, k3 = jax.random.split(key, 3)

    # ---------------- 2-D (NCHW), aligned HW -----------------------------------
    N, C, H, W = 2, 4, 16, 16
    x = jax.random.normal(k1, (N, C, H, W), dtype=jnp.float32) * 2.0 + 0.5
    bn = BatchNormPallas(out_features=C, dimensions=2, affine=False, momentum=0.1)

    bn.training, bn.update_stat = True, True
    y_train = jax.block_until_ready(bn(x))                 # fused resident path
    mean = x.mean(axis=(0, 2, 3), keepdims=True)
    var = ((x - mean) ** 2).mean(axis=(0, 2, 3), keepdims=True)
    y_ref = (x - mean) / jnp.sqrt(var + bn.eps)
    assert jnp.allclose(y_train, y_ref, atol=1e-4, rtol=1e-4)

    bmean, bvar = mean.reshape(C), var.reshape(C)
    n_red = N * H * W
    assert jnp.allclose(bn.current_mean, bmean, atol=1e-4, rtol=1e-4)
    assert jnp.allclose(bn.current_var, bvar, atol=1e-4, rtol=1e-4)
    assert jnp.allclose(bn.running_mean, 0.1 * bmean, atol=1e-4, rtol=1e-4)
    assert jnp.allclose(bn.running_var, 0.9 + 0.1 * bvar * (n_red / (n_red - 1)),
                        atol=1e-4, rtol=1e-4)

    # Forced tiled training path (exercises the 2-core partial-sum stats kernel).
    bn2 = BatchNormPallas(out_features=C, dimensions=2, affine=False, momentum=0.1)
    bn2.resident_limit_bytes = 0
    bn2.stats_target_bytes = 4096                          # forces n_par=2, tiny tiles
    bn2.training, bn2.update_stat = True, True
    y_train2 = jax.block_until_ready(bn2(x))
    assert jnp.allclose(y_train2, y_ref, atol=1e-4, rtol=1e-4)
    assert jnp.allclose(bn2.running_mean, bn.running_mean, atol=1e-4, rtol=1e-4)
    assert jnp.allclose(bn2.running_var, bn.running_var, atol=1e-4, rtol=1e-4)

    # Frozen current-stat path (training=True, update_stat=False).
    bn.update_stat = False
    y_frozen = jax.block_until_ready(bn(x))
    assert jnp.allclose(y_frozen, y_ref, atol=1e-4, rtol=1e-4)

    # Eval path (running stats).
    bn.training = False
    y_eval = jax.block_until_ready(bn(x))
    rm = bn.running_mean.reshape(1, C, 1, 1)
    rv = bn.running_var.reshape(1, C, 1, 1)
    assert jnp.allclose(y_eval, (x - rm) / jnp.sqrt(rv + bn.eps), atol=1e-4, rtol=1e-4)

    # ---------------- 2-D with non-128-aligned spatial (7x7) -------------------
    xb = jax.random.normal(k3, (2, 16, 7, 7), dtype=jnp.float32) - 0.3
    bnb = BatchNormPallas(out_features=16, dimensions=2, affine=False, momentum=0.1)
    bnb.resident_limit_bytes = 0                           # tiled stats + flattened lane apply
    bnb.training, bnb.update_stat = True, True
    yb = jax.block_until_ready(bnb(xb))
    mb = xb.mean(axis=(0, 2, 3), keepdims=True)
    vb = ((xb - mb) ** 2).mean(axis=(0, 2, 3), keepdims=True)
    assert jnp.allclose(yb, (xb - mb) / jnp.sqrt(vb + bnb.eps), atol=1e-4, rtol=1e-4)

    # ---------------- channel-layout apply path (C>=8, HW%128==0) --------------
    xc = jax.random.normal(k3, (2, 8, 16, 8), dtype=jnp.float32) + 1.0
    bnc = BatchNormPallas(out_features=8, dimensions=2, affine=False)
    bnc.training = False
    yc = jax.block_until_ready(bnc(xc))
    assert jnp.allclose(yc, xc / jnp.sqrt(1.0 + bnc.eps), atol=1e-4, rtol=1e-4)

    # ---------------- 1-D (N, C) ------------------------------------------------
    x1 = jax.random.normal(k2, (8, 32), dtype=jnp.float32) * 1.5 - 0.25
    bn1 = BatchNormPallas(out_features=32, dimensions=1, affine=False, momentum=0.1)
    bn1.training, bn1.update_stat = True, True
    y1 = jax.block_until_ready(bn1(x1))                    # resident path
    m1 = x1.mean(axis=0)
    v1 = ((x1 - m1) ** 2).mean(axis=0)
    assert jnp.allclose(y1, (x1 - m1) / jnp.sqrt(v1 + bn1.eps), atol=1e-4, rtol=1e-4)

    bn1b = BatchNormPallas(out_features=32, dimensions=1, affine=False, momentum=0.1)
    bn1b.resident_limit_bytes = 0                          # tiled 1-D stats + apply
    bn1b.training, bn1b.update_stat = True, True
    y1b = jax.block_until_ready(bn1b(x1))
    assert jnp.allclose(y1b, y1, atol=1e-4, rtol=1e-4)

    print("KERNEL_OK")
</pallas_src>

<mosaic_0001>
module attributes {stable_mosaic.version = 11 : i64} {
  func.func @_bn_resident_kernel(%arg0: i32, %arg1: memref<2x4x256xf32, #tpu.memory_space<vmem>>, %arg2: memref<1x4x1xf32, #tpu.memory_space<vmem>>, %arg3: memref<1x4x1xf32, #tpu.memory_space<vmem>>, %arg4: memref<2x4x256xf32, #tpu.memory_space<vmem>>, %arg5: memref<1x4x1xf32, #tpu.memory_space<vmem>>, %arg6: memref<1x4x1xf32, #tpu.memory_space<vmem>>) attributes {dimension_semantics = [#tpu.dimension_semantics<arbitrary>], iteration_bounds = array<i64: 1>, scalar_prefetch = 0 : i64, scratch_operands = 0 : i64, tpu.core_type = #tpu.core_type<tc>, window_params = [{pipeline_mode = #tpu.pipeline_mode<synchronous>, transform_indices = @transform_0, window_bounds = array<i64: 2, 4, 256>}, {pipeline_mode = #tpu.pipeline_mode<synchronous>, transform_indices = @transform_1, window_bounds = array<i64: 1, 4, 1>}, {pipeline_mode = #tpu.pipeline_mode<synchronous>, transform_indices = @transform_2, window_bounds = array<i64: 1, 4, 1>}, {pipeline_mode = #tpu.pipeline_mode<synchronous>, transform_indices = @transform_3, window_bounds = array<i64: 2, 4, 256>}, {pipeline_mode = #tpu.pipeline_mode<synchronous>, transform_indices = @transform_4, window_bounds = array<i64: 1, 4, 1>}, {pipeline_mode = #tpu.pipeline_mode<synchronous>, transform_indices = @transform_5, window_bounds = array<i64: 1, 4, 1>}]} {
    %c0 = arith.constant 0 : index
    %c0_0 = arith.constant 0 : index
    %c0_1 = arith.constant 0 : index
    %0 = vector.load %arg1[%c0, %c0_0, %c0_1] : memref<2x4x256xf32, #tpu.memory_space<vmem>>, vector<2x4x256xf32>
    %cst = arith.constant dense<0.000000e+00> : vector<2x4xf32>
    %1 = vector.multi_reduction <add>, %0, %cst [2] : vector<2x4x256xf32> to vector<2x4xf32>
    %2 = vector.shape_cast %1 : vector<2x4xf32> to vector<2x4x1xf32>
    %cst_2 = arith.constant dense<0.000000e+00> : vector<4x1xf32>
    %3 = vector.multi_reduction <add>, %2, %cst_2 [0] : vector<2x4x1xf32> to vector<4x1xf32>
    %4 = vector.shape_cast %3 : vector<4x1xf32> to vector<1x4x1xf32>
    %cst_3 = arith.constant 0.001953125 : f32
    %5 = vector.broadcast %cst_3 : f32 to vector<1x4x1xf32>
    %6 = arith.mulf %4, %5 : vector<1x4x1xf32>
    %7 = vector.broadcast %6 : vector<1x4x1xf32> to vector<2x4x256xf32>
    %8 = arith.subf %0, %7 : vector<2x4x256xf32>
    %9 = arith.mulf %8, %8 : vector<2x4x256xf32>
    %cst_4 = arith.constant dense<0.000000e+00> : vector<2x4xf32>
    %10 = vector.multi_reduction <add>, %9, %cst_4 [2] : vector<2x4x256xf32> to vector<2x4xf32>
    %11 = vector.shape_cast %10 : vector<2x4xf32> to vector<2x4x1xf32>
    %cst_5 = arith.constant dense<0.000000e+00> : vector<4x1xf32>
    %12 = vector.multi_reduction <add>, %11, %cst_5 [0] : vector<2x4x1xf32> to vector<4x1xf32>
    %13 = vector.shape_cast %12 : vector<4x1xf32> to vector<1x4x1xf32>
    %cst_6 = arith.constant 0.001953125 : f32
    %14 = vector.broadcast %cst_6 : f32 to vector<1x4x1xf32>
    %15 = arith.mulf %13, %14 : vector<1x4x1xf32>
    %c0_7 = arith.constant 0 : index
    %c0_8 = arith.constant 0 : index
    %c0_9 = arith.constant 0 : index
    %16 = vector.load %arg2[%c0_7, %c0_8, %c0_9] : memref<1x4x1xf32, #tpu.memory_space<vmem>>, vector<1x4x1xf32>
    %cst_10 = arith.constant 9.99999974E-6 : f32
    %17 = vector.broadcast %cst_10 : f32 to vector<1x4x1xf32>
    %18 = arith.addf %15, %17 : vector<1x4x1xf32>
    %19 = math.rsqrt %18 : vector<1x4x1xf32>
    %20 = arith.mulf %16, %19 : vector<1x4x1xf32>
    %21 = vector.broadcast %20 : vector<1x4x1xf32> to vector<2x4x256xf32>
    %22 = arith.mulf %8, %21 : vector<2x4x256xf32>
    %c0_11 = arith.constant 0 : index
    %c0_12 = arith.constant 0 : index
    %c0_13 = arith.constant 0 : index
    %23 = vector.load %arg3[%c0_11, %c0_12, %c0_13] : memref<1x4x1xf32, #tpu.memory_space<vmem>>, vector<1x4x1xf32>
    %24 = vector.broadcast %23 : vector<1x4x1xf32> to vector<2x4x256xf32>
    %25 = arith.addf %22, %24 : vector<2x4x256xf32>
    %c0_14 = arith.constant 0 : index
    %c0_15 = arith.constant 0 : index
    %c0_16 = arith.constant 0 : index
    %26 = vector.load %arg4[%c0_14, %c0_15, %c0_16] : memref<2x4x256xf32, #tpu.memory_space<vmem>>, vector<2x4x256xf32>
    tpu.vector_store %arg4[%c0_14, %c0_15, %c0_16], %25 {strides = array<i32>} : memref<2x4x256xf32, #tpu.memory_space<vmem>>, vector<2x4x256xf32>,
    %c0_17 = arith.constant 0 : index
    %c0_18 = arith.constant 0 : index
    %c0_19 = arith.constant 0 : index
    %27 = vector.load %arg5[%c0_17, %c0_18, %c0_19] : memref<1x4x1xf32, #tpu.memory_space<vmem>>, vector<1x4x1xf32>
    tpu.vector_store %arg5[%c0_17, %c0_18, %c0_19], %6 {strides = array<i32>} : memref<1x4x1xf32, #tpu.memory_space<vmem>>, vector<1x4x1xf32>,
    %c0_20 = arith.constant 0 : index
    %c0_21 = arith.constant 0 : index
    %c0_22 = arith.constant 0 : index
    %28 = vector.load %arg6[%c0_20, %c0_21, %c0_22] : memref<1x4x1xf32, #tpu.memory_space<vmem>>, vector<1x4x1xf32>
    tpu.vector_store %arg6[%c0_20, %c0_21, %c0_22], %15 {strides = array<i32>} : memref<1x4x1xf32, #tpu.memory_space<vmem>>, vector<1x4x1xf32>,
    return
  }
  func.func @transform_0(%arg0: i32) -> (i32, i32, i32) {
    %c0_i32 = arith.constant 0 : i32
    %c0_i32_0 = arith.constant 0 : i32
    %c0_i32_1 = arith.constant 0 : i32
    %c0_i32_2 = arith.constant 0 : i32
    return %c0_i32, %c0_i32_0, %c0_i32_1 : i32, i32, i32
  }
  func.func @transform_1(%arg0: i32) -> (i32, i32, i32) {
    %c0_i32 = arith.constant 0 : i32
    %c0_i32_0 = arith.constant 0 : i32
    %c0_i32_1 = arith.constant 0 : i32
    %c0_i32_2 = arith.constant 0 : i32
    return %c0_i32, %c0_i32_0, %c0_i32_1 : i32, i32, i32
  }
  func.func @transform_2(%arg0: i32) -> (i32, i32, i32) {
    %c0_i32 = arith.constant 0 : i32
    %c0_i32_0 = arith.constant 0 : i32
    %c0_i32_1 = arith.constant 0 : i32
    %c0_i32_2 = arith.constant 0 : i32
    return %c0_i32, %c0_i32_0, %c0_i32_1 : i32, i32, i32
  }
  func.func @transform_3(%arg0: i32) -> (i32, i32, i32) {
    %c0_i32 = arith.constant 0 : i32
    %c0_i32_0 = arith.constant 0 : i32
    %c0_i32_1 = arith.constant 0 : i32
    %c0_i32_2 = arith.constant 0 : i32
    return %c0_i32, %c0_i32_0, %c0_i32_1 : i32, i32, i32
  }
  func.func @transform_4(%arg0: i32) -> (i32, i32, i32) {
    %c0_i32 = arith.constant 0 : i32
    %c0_i32_0 = arith.constant 0 : i32
    %c0_i32_1 = arith.constant 0 : i32
    %c0_i32_2 = arith.constant 0 : i32
    return %c0_i32, %c0_i32_0, %c0_i32_1 : i32, i32, i32
  }
  func.func @transform_5(%arg0: i32) -> (i32, i32, i32) {
    %c0_i32 = arith.constant 0 : i32
    %c0_i32_0 = arith.constant 0 : i32
    %c0_i32_1 = arith.constant 0 : i32
    %c0_i32_2 = arith.constant 0 : i32
    return %c0_i32, %c0_i32_0, %c0_i32_1 : i32, i32, i32
  }
}

</mosaic_0001>

<bundles_post_ra>
// kernel: tpu_custom_call.1
= control target key start
LH: loop header
LB: loop body
LE: loop exit
PB: predicated region body
PF: predicated region fallthrough
CT: control target
= control target key end

     0   :  { %11 = vsyncpa [#allocation3], 0  ;;  %s303_s0 = inlined_call_operand.hbm [shape: f32[2,4,256], index: 0, kind: input, shape index: {}]   ;;  %s304_s1 = inlined_call_operand.vmem [shape: f32[1,4,1], index: 1, kind: input, shape index: {}]   ;;  %s305_s2 = inlined_call_operand.vmem [shape: f32[1,4,1], index: 2, kind: input, shape index: {}]   ;;  %s306_s3 = inlined_call_operand.hbm [shape: f32[2,4,256], index: 3, kind: output, shape index: {0}]   ;;  %s307_s4 = inlined_call_operand.vmem [shape: f32[1,4,1], index: 4, kind: output, shape index: {1}]   ;;  %s308_s5 = inlined_call_operand.vmem [shape: f32[1,4,1], index: 5, kind: output, shape index: {2}]  }
   0x1   :  { %12 = vsyncpa [#allocation4], 0  ;;  %s211_s18 = smov [#allocation2]   ;;  %s163_s22 = scalar_lea.hbm %s303_s0, 256 }
   0x2   :  { %s18_s19 = sshll.u32 %s211_s18, 4  ;;  %p164_p0 = scmp.ne.s32.totalorder %s303_s0, %s163_s22  ;;  %s19_s19 = int_to_ptr.vmem [resolvable:$true] %s18_s19 }
   0x3   :  { %p167_p1 = scmp.lt.u32.totalorder %s163_s22, %s303_s0 }
   0x5   :  { %p169_p2 = pnand %p167_p1, %p164_p0 }
   0x7   :  { %172 = shalt.err (!%p169_p2)
}
   0x8   :  { %s173_s27 = scalar_lea.vmem %s19_s19, 256  ;;  %p178_p4 = scmp.lt.s32.totalorder %s19_s19, %s19_s19 }
   0x9   :  { %p174_p3 = scmp.ne.s32.totalorder %s19_s19, %s173_s27  ;;  %p179_p5 = scmp.lt.s32.totalorder %s173_s27, %s173_s27 }
   0xb   :  { %p180_p6 = por %p179_p5, %p178_p4 }
   0xd   :  { %p181_p7 = pnand %p180_p6, %p174_p3 }
   0xf   :  { %184 = shalt.err (!%p181_p7)
}
  0x10   :  { %s212_s28 = smov 128   ;;  %s213_s29 = smov 8  }
  0x11   :  { %24 = dma.hbm_to_vmem [thread:$0]  %s303_s0, 256, %s19_s19, [#allocation3], %s212_s28, %s212_s28, %s213_s29  }
  0x12   :  { %207 = dma.done.wait [#allocation3], 256  }
  0x13   :  { %208 = vsyncadd [#allocation3], 4294967040  ;;  %vm40_vm0 = vcmask 1043456   ;;  %v32_v0 = vld [vmem:[#allocation2] sm:$0xff]  ;;  %v33_v1 = vld [vmem:[#allocation2 + $0x8] sm:$0xff]  ;;  %v59_v12 = vlaneseq  ;;  %vm123_vm1 = vcmask 3072  }
  0x14   :  { %v36_v2 = vcombine.high %v32_v0, %v32_v0  ;;  %v41_v3 = vsel %vm40_vm0, %v32_v0, 0.0  ;;  %v37_v4 = vcombine.high %v33_v1, %v33_v1  ;;  %v46_v6 = vsel %vm40_vm0, %v33_v1, 0.0  ;;  %v106_v36 = vld [vmem:[%s305_s2] sm:$0xf]  ;;  %s216_s2 = smov [#allocation5]  }
  0x15   :  { %v214_v10 = vmov 839922192   ;;  %v60_v15 = vshrl.u32 %v59_v12, 7  ;;  %v215_v35 = vmov 0   ;;  %v88_v44 = vld [vmem:[%s304_s1] sm:$0xf] }
  0x16   :  { %v42_v5 = vsel %vm40_vm0, %v36_v2, 0.0  ;;  %v47_v7 = vsel %vm40_vm0, %v37_v4, 0.0  ;;  %v57_v11 = vunpack.c.l.s4 %v214_v10  ;;  %157 = vset.pattern.permute.xlu0 %v215_v35  ;;  %158 = vset.pattern.permute.xlu1 %v215_v35  ;;  %s131_s13 = sshll.u32 %s216_s2, 4  ;;  %s132_s13 = int_to_ptr.vmem [resolvable:$true] %s131_s13 }
  0x17   :  { %v43_v8 = vadd.f32 %v42_v5, %v41_v3  ;;  %v48_v9 = vadd.f32 %v47_v7, %v46_v6  ;;  %p190_p9 = scmp.lt.s32.totalorder %s132_s13, %s132_s13 }
  0x18   :  { %v58_v14 = vunpack.c.0.s8 %v57_v11 }
  0x19   :  { %44 = vadd.xlane.f32.xlu0 %v43_v8 }
  0x1a   :  { %v61_v19 = vsub.s32 %v58_v14, %v60_v15 }
  0x1d   :  { %49 = vadd.xlane.f32.xlu0 %v48_v9 }
  0xa6   :  { %v45_v13 = vpop.xlane.xlu0 %44 }
  0xa7   :  { %v51_v17 = vsel %vm40_vm0, %v45_v13, 0.0 }
  0xaa   :  { %v50_v16 = vpop.xlane.xlu0 %49 }
  0xab   :  { %v52_v18 = vsel %vm40_vm0, %v50_v16, 0.0 }
  0xac   :  { %v53_v20 = vadd.f32 %v52_v18, %v51_v17 }
  0xae   :  { %v54_v21 = vmul.f32 0.001953125, %v53_v20 }
  0xb0   :  { %v62_v22 = vrot.slane %v54_v21, %v61_v19  ;;  %124 = vst.msk [vmem:[%s307_s4] sm:$0xf] %vm123_vm1, %v54_v21 }
  0xb2   :  { %v65_v23 = vsub.f32 %v33_v1, %v62_v22  ;;  %v64_v24 = vsub.f32 %v32_v0, %v62_v22 }
  0xb4   :  { %v66_v25 = vmul.f32 %v64_v24, %v64_v24  ;;  %v67_v26 = vmul.f32 %v65_v23, %v65_v23 }
  0xb6   :  { %v70_v27 = vcombine.high %v66_v25, %v66_v25  ;;  %v71_v28 = vcombine.high %v67_v26, %v67_v26  ;;  %v74_v29 = vsel %vm40_vm0, %v66_v25, 0.0  ;;  %v79_v33 = vsel %vm40_vm0, %v67_v26, 0.0 }
  0xb8   :  { %v75_v30 = vsel %vm40_vm0, %v70_v27, 0.0  ;;  %v80_v32 = vsel %vm40_vm0, %v71_v28, 0.0 }
  0xb9   :  { %v76_v31 = vadd.f32 %v75_v30, %v74_v29  ;;  %v81_v34 = vadd.f32 %v80_v32, %v79_v33 }
  0xbb   :  { %77 = vadd.xlane.f32.xlu1 %v76_v31 }
  0xbf   :  { %82 = vadd.xlane.f32.xlu1 %v81_v34 }
  0xd0   :  { %109 = vperm.xlu1 %158, %v106_v36  }
 0x148   :  { %v78_v37 = vpop.xlane.xlu1 %77 }
 0x149   :  { %v84_v39 = vsel %vm40_vm0, %v78_v37, 0.0 }
 0x14c   :  { %v83_v38 = vpop.xlane.xlu1 %82 }
 0x14d   :  { %v85_v40 = vsel %vm40_vm0, %v83_v38, 0.0 }
 0x14e   :  { %v86_v41 = vadd.f32 %v85_v40, %v84_v39 }
 0x150   :  { %v87_v42 = vmul.f32 0.001953125, %v86_v41  ;;  %v110_v47 = vpop.permute.xlu1 %109 }
 0x151   :  { %v117_v50 = vrot.slane %v110_v47, %v61_v19 }
 0x152   :  { %v89_v43 = vadd.f32 1e-05, %v87_v42  ;;  %125 = vst.msk [vmem:[%s308_s5] sm:$0xf] %vm123_vm1, %v87_v42  ;;  %s185_s5 = scalar_lea.vmem %s132_s13, 256 }
 0x153   :  { %p186_p8 = scmp.ne.s32.totalorder %s132_s13, %s185_s5  ;;  %p191_p10 = scmp.lt.s32.totalorder %s185_s5, %s185_s5 }
 0x154   :  { %161 = vrsqrt.f32 %v89_v43 }
 0x155   :  { %p192_p11 = por %p191_p10, %p190_p9 }
 0x157   :  { %p193_p12 = pnand %p192_p11, %p186_p8 }
 0x15e   :  { %v162_v45 = vpop.eup %161 }
 0x15f   :  { %v91_v46 = vmul.f32 %v162_v45, %v88_v44 }
 0x161   :  { %94 = vperm.xlu0 %157, %v91_v46  }
 0x1e0   :  { %v95_v48 = vpop.permute.xlu0 %94 }
 0x1e1   :  { %v102_v49 = vrot.slane %v95_v48, %v61_v19 }
 0x1e3   :  { %v104_v51 = vmul.f32 %v102_v49, %v64_v24  ;;  %v105_v52 = vmul.f32 %v102_v49, %v65_v23 }
 0x1e5   :  { %v119_v53 = vadd.f32 %v117_v50, %v104_v51  ;;  %v120_v54 = vadd.f32 %v117_v50, %v105_v52 }
 0x1e7   :  { %121 = vst [vmem:[#allocation5] sm:$0xff] %v119_v53  ;;  %122 = vst [vmem:[#allocation5 + $0x8] sm:$0xff] %v120_v54 }
 0x1e8   :  { %196 = shalt.err (!%p193_p12)
}
 0x1e9   :  { %s197_s15 = scalar_lea.hbm %s306_s3, 256 }
 0x1ea   :  { %p198_p13 = scmp.ne.s32.totalorder %s306_s3, %s197_s15  ;;  %p201_p0 = scmp.lt.u32.totalorder %s197_s15, %s306_s3 }
 0x1ec   :  { %p203_p1 = pnand %p201_p0, %p198_p13 }
 0x1ee   :  { %206 = shalt.err (!%p203_p1)
}
 0x1ef   :  { %137 = dma.vmem_to_hbm [thread:$0]  %s132_s13, 256, %s306_s3, [#allocation4], %s212_s28, %s212_s28, %s213_s29  }
 0x1f0   :  { %209 = dma.done.wait [#allocation4], 256  }
 0x1f1   :  { %210 = vsyncadd [#allocation4], 4294967040 }
 0x1f2   :  { %149 = vsyncpa [#allocation3], 1 }
 0x1f3   :  { %150 = vsyncpa [#allocation4], 1 }

</bundles_post_ra>
